<compile_context>
chip_gen: v6e
topology: v6e:2x2x1
jax: 0.10.0
libtpu: 0.0.40
codegen_flags: <defaults>
</compile_context>

<pallas_src>
import jax
import jax.numpy as jnp
from jax.experimental import pallas as pl
from jax.experimental.pallas import tpu as pltpu


def _lovasz_hinge_kernel(rows_c_ref, rows_e_ref, ecols_ref, out_ref,
                         acc_ref, gts_ref):
    # rows_c_ref : (3, CC)  [logits; labels; ones] of the current c-chunk (lane-dense)
    # rows_e_ref : (3, TE)  [logits; labels; ones] of the current e-tile  (lane-dense)
    # ecols_ref  : (TE, 2)  [logits, labels] of the current e-tile (column layout)
    # out_ref    : (1, 128) per-(image, e-tile) partial loss (broadcast scalar)
    # acc_ref    : (2, TE)  f32 scratch, rows [wsum ; rank], accumulated over c
    # gts_ref    : (1, 1)   f32 scratch, #positive pixels, accumulated over c
    t = pl.program_id(1)
    c = pl.program_id(2)
    num_c = pl.num_programs(2)
    TE = rows_e_ref.shape[-1]
    CC = rows_c_ref.shape[-1]

    @pl.when(c == 0)
    def _init():
        acc_ref[...] = jnp.zeros_like(acc_ref)
        gts_ref[...] = jnp.zeros_like(gts_ref)

    # Hinge errors, identical f32 expression in both layouts so the
    # exact-equality tie-break below sees bit-identical values.
    logits_c = rows_c_ref[0:1, :]
    labels_c = rows_c_ref[1:2, :]
    err_c = 1.0 - logits_c * (2.0 * labels_c - 1.0)                 # (1, CC)

    logits_e = ecols_ref[:, 0:1]
    labels_e = ecols_ref[:, 1:2]
    err_e = 1.0 - logits_e * (2.0 * labels_e - 1.0)                 # (TE, 1)

    # Total positives (exact integer counts in f32, P < 2^24).
    gts_ref[...] += jnp.sum(labels_c, axis=1, keepdims=True)

    # MXU weights: rows [labels_c ; ones]; 0/1 values are exact in bf16.
    w2 = rows_c_ref[1:3, :].astype(jnp.bfloat16)                    # (2, CC)

    def _accum(before_mask):
        # i1 -> f32 -> bf16 (both converts are universally supported); values
        # stay exactly 0/1 so the f32 matmul accumulation below is exact.
        before = before_mask.astype(jnp.float32).astype(jnp.bfloat16)  # (TE, CC)
        # Attention-style contraction over the lane (c) axis on the MXU:
        #   out[w, e] = sum_c w2[w, c] * before[e, c]   -> rows [wsum ; rank]
        acc_ref[...] += jax.lax.dot_general(
            w2, before,
            dimension_numbers=(((1,), (1,)), ((), ())),
            preferred_element_type=jnp.float32)

    # Pixel c strictly precedes pixel e iff err_c > err_e, or err_c == err_e and
    # c < e (stable descending order).  Off the diagonal chunk the index
    # comparison is uniform, so a single compare suffices.
    lt_all = (c + 1) * CC <= t * TE          # every c index < every e index
    gt_all = c * CC >= (t + 1) * TE          # every c index > every e index

    @pl.when(lt_all)
    def _():
        _accum(err_c >= err_e)

    @pl.when(gt_all)
    def _():
        _accum(err_c > err_e)

    @pl.when(jnp.logical_not(jnp.logical_or(lt_all, gt_all)))
    def _():
        e_idx = jax.lax.broadcasted_iota(jnp.int32, (TE, 1), 0) + t * TE
        c_idx = jax.lax.broadcasted_iota(jnp.int32, (1, CC), 1) + c * CC
        _accum((err_c > err_e) | ((err_c == err_e) & (c_idx < e_idx)))

    @pl.when(c == num_c - 1)
    def _finalize():
        # Lane-dense (1, TE) epilogue.
        wsum = acc_ref[0:1, :]
        rank = acc_ref[1:2, :]
        gts = gts_ref[...]                                          # (1, 1)
        logits_er = rows_e_ref[0:1, :]
        labels_er = rows_e_ref[1:2, :]
        err_er = 1.0 - logits_er * (2.0 * labels_er - 1.0)          # (1, TE)

        cg = wsum + labels_er                 # cumulative positives incl. e
        # jaccard at e's sorted position k = rank[e]
        union1 = gts + (rank + 1.0) - cg
        j1 = 1.0 - (gts - cg) / union1
        # jaccard at position k - 1 (guard the rank==0 / gts==0 corner)
        union0 = jnp.where(rank < 0.5, 1.0, gts + rank - wsum)
        j0 = 1.0 - (gts - wsum) / union0
        grad = jnp.where(rank < 0.5, j1, j1 - j0)

        partial = jnp.sum(jnp.maximum(err_er, 0.0) * grad)
        out_ref[...] = jnp.zeros_like(out_ref) + partial


def lovasz_hinge_loss(inputs, targets, *, tile_e=None, chunk_c=None):
    """Equivalent of LovaszHingeLoss().forward(input, target).

    inputs, targets: (B, 1, H, W); per_image=True, ignore=None.
    """
    B, C, H, W = inputs.shape
    assert C == 1, "module squeezes a singleton channel dim"
    P = H * W
    assert P < (1 << 24), "f32 rank/count accumulation is exact only below 2^24"
    if tile_e is None:
        tile_e = min(P, 256)     # sorted-element (sublane) tile; sweepable
    if chunk_c is None:
        chunk_c = min(P, 512)    # all-pixels (lane) chunk; keeps the slab vreg-sized
    assert tile_e % 128 == 0 and P % tile_e == 0
    assert chunk_c % 128 == 0 and P % chunk_c == 0
    num_t = P // tile_e
    num_c = P // chunk_c

    logits = inputs.reshape(B, P).astype(jnp.float32)
    labels = targets.reshape(B, P).astype(jnp.float32)

    # Lane-dense rows [logits; labels; ones] (the ones row is the MXU weight for
    # rank) plus a small column-layout copy of (logits, labels) for the e-tiles.
    rows = jnp.stack([logits, labels, jnp.ones_like(labels)], axis=1)   # (B, 3, P)
    ecols = jnp.stack([logits, labels], axis=-1)                        # (B, P, 2)

    per_tile = pl.pallas_call(
        _lovasz_hinge_kernel,
        out_shape=jax.ShapeDtypeStruct((B, 1, num_t * 128), jnp.float32),
        grid_spec=pltpu.PrefetchScalarGridSpec(
            num_scalar_prefetch=0,
            grid=(B, num_t, num_c),
            in_specs=[
                pl.BlockSpec((None, 3, chunk_c), lambda b, t, c: (b, 0, c)),
                pl.BlockSpec((None, 3, tile_e), lambda b, t, c: (b, 0, t)),
                pl.BlockSpec((None, tile_e, 2), lambda b, t, c: (b, t, 0)),
            ],
            out_specs=pl.BlockSpec((None, 1, 128), lambda b, t, c: (b, 0, t)),
            scratch_shapes=[
                pltpu.VMEM((2, tile_e), jnp.float32),   # [wsum ; rank] accumulator
                pltpu.VMEM((1, 1), jnp.float32),        # gts accumulator
            ],
        ),
        compiler_params=pltpu.CompilerParams(
            # b and t write independent output blocks -> both "parallel"
            # (covers v7x's 2 TensorCores even when B == 1); c is the reduction.
            # Resident blocks are ~1 MiB, so the default scoped VMEM limit is
            # ample everywhere and leaves headroom inside v7x's 64 MiB VMEM.
            dimension_semantics=("parallel", "parallel", "arbitrary"),
        ),
    )(rows, rows, ecols)

    # per_image=True -> mean over images of the per-image loss (sum of e-tiles).
    per_image = jnp.sum(per_tile[:, 0, ::128], axis=1)
    return jnp.mean(per_image)


def _lovasz_hinge_ref(inputs, targets):
    """Pure-JAX reference (mirrors the PyTorch code) for a sanity check."""
    def per_image(log, lab):
        log = log.reshape(-1)
        lab = lab.reshape(-1).astype(jnp.float32)
        signs = 2.0 * lab - 1.0
        errors = 1.0 - log * signs
        order = jnp.argsort(-errors)
        errors_sorted = errors[order]
        gt_sorted = lab[order]
        gts = gt_sorted.sum()
        intersection = gts - jnp.cumsum(gt_sorted)
        union = gts + jnp.cumsum(1.0 - gt_sorted)
        jaccard = 1.0 - intersection / union
        jaccard = jnp.concatenate([jaccard[:1], jaccard[1:] - jaccard[:-1]])
        return jnp.dot(jnp.maximum(errors_sorted, 0.0), jaccard)

    B = inputs.shape[0]
    losses = jax.vmap(per_image)(inputs.reshape(B, -1), targets.reshape(B, -1))
    return jnp.mean(losses)


if __name__ == "__main__":
    key = jax.random.PRNGKey(0)
    k1, k2 = jax.random.split(key)

    B, C, H, W = 2, 1, 16, 16
    logits = jax.random.normal(k1, (B, C, H, W), dtype=jnp.float32)
    labels = jax.random.bernoulli(k2, 0.5, (B, C, H, W)).astype(jnp.float32)

    # tile_e = chunk_c = 128 -> a 2x2 (e-tile, c-chunk) grid per image, which
    # exercises the accumulator reset/finalize and all three tie-break branches.
    loss = jax.block_until_ready(
        lovasz_hinge_loss(logits, labels, tile_e=128, chunk_c=128))
    ref = jax.block_until_ready(_lovasz_hinge_ref(logits, labels))

    assert jnp.isfinite(loss)
    assert jnp.allclose(loss, ref, rtol=1e-4, atol=1e-4), (loss, ref)
    print("KERNEL_OK")
</pallas_src>

<mosaic_0001>
module attributes {stable_mosaic.version = 11 : i64} {
  func.func @_lovasz_hinge_kernel(%arg0: i32, %arg1: i32, %arg2: i32, %arg3: memref<1x3x128xf32, #tpu.memory_space<vmem>>, %arg4: memref<1x3x128xf32, #tpu.memory_space<vmem>>, %arg5: memref<1x128x2xf32, #tpu.memory_space<vmem>>, %arg6: memref<1x1x128xf32, #tpu.memory_space<vmem>>, %arg7: memref<2x128xf32, #tpu.memory_space<vmem>>, %arg8: memref<1x1xf32, #tpu.memory_space<vmem>>) attributes {dimension_semantics = [#tpu.dimension_semantics<parallel>, #tpu.dimension_semantics<parallel>, #tpu.dimension_semantics<arbitrary>], iteration_bounds = array<i64: 2, 2, 2>, scalar_prefetch = 0 : i64, scratch_operands = 2 : i64, tpu.core_type = #tpu.core_type<tc>, window_params = [{transform_indices = @transform_0, window_bounds = array<i64: 1, 3, 128>}, {transform_indices = @transform_1, window_bounds = array<i64: 1, 3, 128>}, {transform_indices = @transform_2, window_bounds = array<i64: 1, 128, 2>}, {transform_indices = @transform_3, window_bounds = array<i64: 1, 1, 128>}]} {
    %c0_i32 = arith.constant 0 : i32
    %0 = arith.cmpi eq, %arg2, %c0_i32 : i32
    %1 = arith.extui %0 : i1 to i32
    %c0_i32_0 = arith.constant 0 : i32
    %2 = arith.cmpi ne, %1, %c0_i32_0 : i32
    scf.if %2 {
      %cst_33 = arith.constant 0.000000e+00 : f32
      %52 = vector.broadcast %cst_33 : f32 to vector<2x128xf32>
      %c0_34 = arith.constant 0 : index
      %c0_35 = arith.constant 0 : index
      %53 = vector.load %arg7[%c0_34, %c0_35] : memref<2x128xf32, #tpu.memory_space<vmem>>, vector<2x128xf32>
      tpu.vector_store %arg7[%c0_34, %c0_35], %52 {strides = array<i32>} : memref<2x128xf32, #tpu.memory_space<vmem>>, vector<2x128xf32>,
      %cst_36 = arith.constant 0.000000e+00 : f32
      %54 = vector.broadcast %cst_36 : f32 to vector<1x1xf32>
      %c0_37 = arith.constant 0 : index
      %c0_38 = arith.constant 0 : index
      %55 = vector.load %arg8[%c0_37, %c0_38] : memref<1x1xf32, #tpu.memory_space<vmem>>, vector<1x1xf32>
      tpu.vector_store %arg8[%c0_37, %c0_38], %54 {strides = array<i32>} : memref<1x1xf32, #tpu.memory_space<vmem>>, vector<1x1xf32>,
    } else {
    }
    %c0 = arith.constant 0 : index
    %c0_1 = arith.constant 0 : index
    %c0_2 = arith.constant 0 : index
    %3 = vector.load %arg3[%c0, %c0_1, %c0_2] : memref<1x3x128xf32, #tpu.memory_space<vmem>>, vector<1x1x128xf32>
    %4 = vector.shape_cast %3 : vector<1x1x128xf32> to vector<1x128xf32>
    %c0_3 = arith.constant 0 : index
    %c1 = arith.constant 1 : index
    %c0_4 = arith.constant 0 : index
    %5 = vector.load %arg3[%c0_3, %c1, %c0_4] : memref<1x3x128xf32, #tpu.memory_space<vmem>>, vector<1x1x128xf32>
    %6 = vector.shape_cast %5 : vector<1x1x128xf32> to vector<1x128xf32>
    %cst = arith.constant 2.000000e+00 : f32
    %7 = vector.broadcast %cst : f32 to vector<1x128xf32>
    %8 = arith.mulf %7, %6 : vector<1x128xf32>
    %cst_5 = arith.constant 1.000000e+00 : f32
    %9 = vector.broadcast %cst_5 : f32 to vector<1x128xf32>
    %10 = arith.subf %8, %9 : vector<1x128xf32>
    %11 = arith.mulf %4, %10 : vector<1x128xf32>
    %cst_6 = arith.constant 1.000000e+00 : f32
    %12 = vector.broadcast %cst_6 : f32 to vector<1x128xf32>
    %13 = arith.subf %12, %11 : vector<1x128xf32>
    %c0_7 = arith.constant 0 : index
    %c0_8 = arith.constant 0 : index
    %c0_9 = arith.constant 0 : index
    %14 = vector.load %arg5[%c0_7, %c0_8, %c0_9] : memref<1x128x2xf32, #tpu.memory_space<vmem>>, vector<1x128x1xf32>
    %15 = vector.shape_cast %14 : vector<1x128x1xf32> to vector<128x1xf32>
    %c0_10 = arith.constant 0 : index
    %c0_11 = arith.constant 0 : index
    %c1_12 = arith.constant 1 : index
    %16 = vector.load %arg5[%c0_10, %c0_11, %c1_12] : memref<1x128x2xf32, #tpu.memory_space<vmem>>, vector<1x128x1xf32>
    %17 = vector.shape_cast %16 : vector<1x128x1xf32> to vector<128x1xf32>
    %cst_13 = arith.constant 2.000000e+00 : f32
    %18 = vector.broadcast %cst_13 : f32 to vector<128x1xf32>
    %19 = arith.mulf %18, %17 : vector<128x1xf32>
    %cst_14 = arith.constant 1.000000e+00 : f32
    %20 = vector.broadcast %cst_14 : f32 to vector<128x1xf32>
    %21 = arith.subf %19, %20 : vector<128x1xf32>
    %22 = arith.mulf %15, %21 : vector<128x1xf32>
    %cst_15 = arith.constant 1.000000e+00 : f32
    %23 = vector.broadcast %cst_15 : f32 to vector<128x1xf32>
    %24 = arith.subf %23, %22 : vector<128x1xf32>
    %c0_16 = arith.constant 0 : index
    %c0_17 = arith.constant 0 : index
    %25 = vector.load %arg8[%c0_16, %c0_17] : memref<1x1xf32, #tpu.memory_space<vmem>>, vector<1x1xf32>
    %cst_18 = arith.constant dense<0.000000e+00> : vector<1xf32>
    %26 = vector.multi_reduction <add>, %6, %cst_18 [1] : vector<1x128xf32> to vector<1xf32>
    %27 = vector.shape_cast %26 : vector<1xf32> to vector<1x1xf32>
    %28 = arith.addf %25, %27 : vector<1x1xf32>
    %c0_19 = arith.constant 0 : index
    %c0_20 = arith.constant 0 : index
    %29 = vector.load %arg8[%c0_19, %c0_20] : memref<1x1xf32, #tpu.memory_space<vmem>>, vector<1x1xf32>
    tpu.vector_store %arg8[%c0_19, %c0_20], %28 {strides = array<i32>} : memref<1x1xf32, #tpu.memory_space<vmem>>, vector<1x1xf32>,
    %c0_21 = arith.constant 0 : index
    %c1_22 = arith.constant 1 : index
    %c0_23 = arith.constant 0 : index
    %30 = vector.load %arg3[%c0_21, %c1_22, %c0_23] : memref<1x3x128xf32, #tpu.memory_space<vmem>>, vector<1x2x128xf32>
    %31 = vector.shape_cast %30 : vector<1x2x128xf32> to vector<2x128xf32>
    %32 = arith.truncf %31 : vector<2x128xf32> to vector<2x128xbf16>
    %c1_i32 = arith.constant 1 : i32
    %33 = arith.addi %arg2, %c1_i32 : i32
    %c128_i32 = arith.constant 128 : i32
    %34 = arith.muli %33, %c128_i32 : i32
    %c128_i32_24 = arith.constant 128 : i32
    %35 = arith.muli %arg1, %c128_i32_24 : i32
    %36 = arith.cmpi sle, %34, %35 : i32
    %c128_i32_25 = arith.constant 128 : i32
    %37 = arith.muli %arg2, %c128_i32_25 : i32
    %c1_i32_26 = arith.constant 1 : i32
    %38 = arith.addi %arg1, %c1_i32_26 : i32
    %c128_i32_27 = arith.constant 128 : i32
    %39 = arith.muli %38, %c128_i32_27 : i32
    %40 = arith.cmpi sge, %37, %39 : i32
    %41 = arith.extui %36 : i1 to i32
    %c0_i32_28 = arith.constant 0 : i32
    %42 = arith.cmpi ne, %41, %c0_i32_28 : i32
    scf.if %42 {
      %52 = vector.broadcast %13 : vector<1x128xf32> to vector<128x128xf32>
      %53 = vector.broadcast %24 : vector<128x1xf32> to vector<128x128xf32>
      %54 = arith.cmpf oge, %52, %53 : vector<128x128xf32>
      %55 = arith.extui %54 : vector<128x128xi1> to vector<128x128xi32>
      %56 = arith.sitofp %55 : vector<128x128xi32> to vector<128x128xf32>
      %57 = arith.truncf %56 : vector<128x128xf32> to vector<128x128xbf16>
      %c0_33 = arith.constant 0 : index
      %c0_34 = arith.constant 0 : index
      %58 = vector.load %arg7[%c0_33, %c0_34] : memref<2x128xf32, #tpu.memory_space<vmem>>, vector<2x128xf32>
      %cst_35 = arith.constant dense<0.000000e+00> : vector<2x128xf32>
      %59 = tpu.matmul %32, %57, %cst_35 {dimension_numbers = #tpu.dot_dimension_numbers<[1], [1], [0], [0], [0, 0, 1, 0], [], []>} : vector<2x128xbf16>, vector<128x128xbf16>, vector<2x128xf32> -> vector<2x128xf32>
      %60 = arith.addf %58, %59 : vector<2x128xf32>
      %c0_36 = arith.constant 0 : index
      %c0_37 = arith.constant 0 : index
      %61 = vector.load %arg7[%c0_36, %c0_37] : memref<2x128xf32, #tpu.memory_space<vmem>>, vector<2x128xf32>
      tpu.vector_store %arg7[%c0_36, %c0_37], %60 {strides = array<i32>} : memref<2x128xf32, #tpu.memory_space<vmem>>, vector<2x128xf32>,
    } else {
    }
    %43 = arith.extui %40 : i1 to i32
    %c0_i32_29 = arith.constant 0 : i32
    %44 = arith.cmpi ne, %43, %c0_i32_29 : i32
    scf.if %44 {
      %52 = vector.broadcast %13 : vector<1x128xf32> to vector<128x128xf32>
      %53 = vector.broadcast %24 : vector<128x1xf32> to vector<128x128xf32>
      %54 = arith.cmpf ogt, %52, %53 : vector<128x128xf32>
      %55 = arith.extui %54 : vector<128x128xi1> to vector<128x128xi32>
      %56 = arith.sitofp %55 : vector<128x128xi32> to vector<128x128xf32>
      %57 = arith.truncf %56 : vector<128x128xf32> to vector<128x128xbf16>
      %c0_33 = arith.constant 0 : index
      %c0_34 = arith.constant 0 : index
      %58 = vector.load %arg7[%c0_33, %c0_34] : memref<2x128xf32, #tpu.memory_space<vmem>>, vector<2x128xf32>
      %cst_35 = arith.constant dense<0.000000e+00> : vector<2x128xf32>
      %59 = tpu.matmul %32, %57, %cst_35 {dimension_numbers = #tpu.dot_dimension_numbers<[1], [1], [0], [0], [0, 0, 1, 0], [], []>} : vector<2x128xbf16>, vector<128x128xbf16>, vector<2x128xf32> -> vector<2x128xf32>
      %60 = arith.addf %58, %59 : vector<2x128xf32>
      %c0_36 = arith.constant 0 : index
      %c0_37 = arith.constant 0 : index
      %61 = vector.load %arg7[%c0_36, %c0_37] : memref<2x128xf32, #tpu.memory_space<vmem>>, vector<2x128xf32>
      tpu.vector_store %arg7[%c0_36, %c0_37], %60 {strides = array<i32>} : memref<2x128xf32, #tpu.memory_space<vmem>>, vector<2x128xf32>,
    } else {
    }
    %45 = arith.ori %36, %40 : i1
    %true = arith.constant true
    %46 = arith.xori %45, %true : i1
    %47 = arith.extui %46 : i1 to i32
    %c0_i32_30 = arith.constant 0 : i32
    %48 = arith.cmpi ne, %47, %c0_i32_30 : i32
    scf.if %48 {
      %52 = tpu.iota {dimensions = array<i32: 0>} : vector<128x1xi32>
      %c128_i32_33 = arith.constant 128 : i32
      %53 = arith.muli %arg1, %c128_i32_33 : i32
      %54 = vector.broadcast %53 : i32 to vector<128x1xi32>
      %55 = arith.addi %52, %54 : vector<128x1xi32>
      %56 = tpu.iota {dimensions = array<i32: 1>} : vector<1x128xi32>
      %c128_i32_34 = arith.constant 128 : i32
      %57 = arith.muli %arg2, %c128_i32_34 : i32
      %58 = vector.broadcast %57 : i32 to vector<1x128xi32>
      %59 = arith.addi %56, %58 : vector<1x128xi32>
      %60 = vector.broadcast %13 : vector<1x128xf32> to vector<128x128xf32>
      %61 = vector.broadcast %24 : vector<128x1xf32> to vector<128x128xf32>
      %62 = arith.cmpf ogt, %60, %61 : vector<128x128xf32>
      %63 = vector.broadcast %13 : vector<1x128xf32> to vector<128x128xf32>
      %64 = vector.broadcast %24 : vector<128x1xf32> to vector<128x128xf32>
      %65 = arith.cmpf oeq, %63, %64 : vector<128x128xf32>
      %66 = vector.broadcast %59 : vector<1x128xi32> to vector<128x128xi32>
      %67 = vector.broadcast %55 : vector<128x1xi32> to vector<128x128xi32>
      %68 = arith.cmpi slt, %66, %67 : vector<128x128xi32>
      %69 = arith.andi %65, %68 : vector<128x128xi1>
      %70 = arith.ori %62, %69 : vector<128x128xi1>
      %71 = arith.extui %70 : vector<128x128xi1> to vector<128x128xi32>
      %72 = arith.sitofp %71 : vector<128x128xi32> to vector<128x128xf32>
      %73 = arith.truncf %72 : vector<128x128xf32> to vector<128x128xbf16>
      %c0_35 = arith.constant 0 : index
      %c0_36 = arith.constant 0 : index
      %74 = vector.load %arg7[%c0_35, %c0_36] : memref<2x128xf32, #tpu.memory_space<vmem>>, vector<2x128xf32>
      %cst_37 = arith.constant dense<0.000000e+00> : vector<2x128xf32>
      %75 = tpu.matmul %32, %73, %cst_37 {dimension_numbers = #tpu.dot_dimension_numbers<[1], [1], [0], [0], [0, 0, 1, 0], [], []>} : vector<2x128xbf16>, vector<128x128xbf16>, vector<2x128xf32> -> vector<2x128xf32>
      %76 = arith.addf %74, %75 : vector<2x128xf32>
      %c0_38 = arith.constant 0 : index
      %c0_39 = arith.constant 0 : index
      %77 = vector.load %arg7[%c0_38, %c0_39] : memref<2x128xf32, #tpu.memory_space<vmem>>, vector<2x128xf32>
      tpu.vector_store %arg7[%c0_38, %c0_39], %76 {strides = array<i32>} : memref<2x128xf32, #tpu.memory_space<vmem>>, vector<2x128xf32>,
    } else {
    }
    %c1_i32_31 = arith.constant 1 : i32
    %49 = arith.cmpi eq, %arg2, %c1_i32_31 : i32
    %50 = arith.extui %49 : i1 to i32
    %c0_i32_32 = arith.constant 0 : i32
    %51 = arith.cmpi ne, %50, %c0_i32_32 : i32
    scf.if %51 {
      %c0_33 = arith.constant 0 : index
      %c0_34 = arith.constant 0 : index
      %52 = vector.load %arg7[%c0_33, %c0_34] : memref<2x128xf32, #tpu.memory_space<vmem>>, vector<1x128xf32>
      %c1_35 = arith.constant 1 : index
      %c0_36 = arith.constant 0 : index
      %53 = vector.load %arg7[%c1_35, %c0_36] : memref<2x128xf32, #tpu.memory_space<vmem>>, vector<1x128xf32>
      %c0_37 = arith.constant 0 : index
      %c0_38 = arith.constant 0 : index
      %54 = vector.load %arg8[%c0_37, %c0_38] : memref<1x1xf32, #tpu.memory_space<vmem>>, vector<1x1xf32>
      %c0_39 = arith.constant 0 : index
      %c0_40 = arith.constant 0 : index
      %c0_41 = arith.constant 0 : index
      %55 = vector.load %arg4[%c0_39, %c0_40, %c0_41] : memref<1x3x128xf32, #tpu.memory_space<vmem>>, vector<1x1x128xf32>
      %56 = vector.shape_cast %55 : vector<1x1x128xf32> to vector<1x128xf32>
      %c0_42 = arith.constant 0 : index
      %c1_43 = arith.constant 1 : index
      %c0_44 = arith.constant 0 : index
      %57 = vector.load %arg4[%c0_42, %c1_43, %c0_44] : memref<1x3x128xf32, #tpu.memory_space<vmem>>, vector<1x1x128xf32>
      %58 = vector.shape_cast %57 : vector<1x1x128xf32> to vector<1x128xf32>
      %cst_45 = arith.constant 2.000000e+00 : f32
      %59 = vector.broadcast %cst_45 : f32 to vector<1x128xf32>
      %60 = arith.mulf %59, %58 : vector<1x128xf32>
      %cst_46 = arith.constant 1.000000e+00 : f32
      %61 = vector.broadcast %cst_46 : f32 to vector<1x128xf32>
      %62 = arith.subf %60, %61 : vector<1x128xf32>
      %63 = arith.mulf %56, %62 : vector<1x128xf32>
      %cst_47 = arith.constant 1.000000e+00 : f32
      %64 = vector.broadcast %cst_47 : f32 to vector<1x128xf32>
      %65 = arith.subf %64, %63 : vector<1x128xf32>
      %66 = arith.addf %52, %58 : vector<1x128xf32>
      %cst_48 = arith.constant 1.000000e+00 : f32
      %67 = vector.broadcast %cst_48 : f32 to vector<1x128xf32>
      %68 = arith.addf %53, %67 : vector<1x128xf32>
      %69 = vector.broadcast %54 : vector<1x1xf32> to vector<1x128xf32>
      %70 = arith.addf %69, %68 : vector<1x128xf32>
      %71 = arith.subf %70, %66 : vector<1x128xf32>
      %72 = vector.broadcast %54 : vector<1x1xf32> to vector<1x128xf32>
      %73 = arith.subf %72, %66 : vector<1x128xf32>
      %74 = arith.divf %73, %71 : vector<1x128xf32>
      %cst_49 = arith.constant 1.000000e+00 : f32
      %75 = vector.broadcast %cst_49 : f32 to vector<1x128xf32>
      %76 = arith.subf %75, %74 : vector<1x128xf32>
      %cst_50 = arith.constant 5.000000e-01 : f32
      %77 = vector.broadcast %cst_50 : f32 to vector<1x128xf32>
      %78 = arith.cmpf olt, %53, %77 : vector<1x128xf32>
      %79 = vector.broadcast %54 : vector<1x1xf32> to vector<1x128xf32>
      %80 = arith.addf %79, %53 : vector<1x128xf32>
      %81 = arith.subf %80, %52 : vector<1x128xf32>
      %cst_51 = arith.constant 1.000000e+00 : f32
      %82 = vector.broadcast %cst_51 : f32 to vector<1x128xf32>
      %83 = arith.select %78, %82, %81 : vector<1x128xi1>, vector<1x128xf32>
      %84 = vector.broadcast %54 : vector<1x1xf32> to vector<1x128xf32>
      %85 = arith.subf %84, %52 : vector<1x128xf32>
      %86 = arith.divf %85, %83 : vector<1x128xf32>
      %cst_52 = arith.constant 1.000000e+00 : f32
      %87 = vector.broadcast %cst_52 : f32 to vector<1x128xf32>
      %88 = arith.subf %87, %86 : vector<1x128xf32>
      %cst_53 = arith.constant 5.000000e-01 : f32
      %89 = vector.broadcast %cst_53 : f32 to vector<1x128xf32>
      %90 = arith.cmpf olt, %53, %89 : vector<1x128xf32>
      %91 = arith.subf %76, %88 : vector<1x128xf32>
      %92 = arith.select %90, %76, %91 : vector<1x128xi1>, vector<1x128xf32>
      %cst_54 = arith.constant 0.000000e+00 : f32
      %93 = vector.broadcast %cst_54 : f32 to vector<1x128xf32>
      %94 = arith.maximumf %65, %93 : vector<1x128xf32>
      %95 = arith.mulf %94, %92 : vector<1x128xf32>
      %96 = vector.shape_cast %95 : vector<1x128xf32> to vector<1x1x128xf32>
      %cst_55 = arith.constant dense<0.000000e+00> : vector<1xf32>
      %97 = vector.multi_reduction <add>, %96, %cst_55 [1, 2] : vector<1x1x128xf32> to vector<1xf32>
      %98 = vector.shape_cast %97 : vector<1xf32> to vector<1x1x1xf32>
      %99 = vector.extract %98[0, 0, 0] : f32 from vector<1x1x1xf32>
      %cst_56 = arith.constant 0.000000e+00 : f32
      %100 = vector.broadcast %cst_56 : f32 to vector<1x128xf32>
      %101 = vector.broadcast %99 : f32 to vector<1x128xf32>
      %102 = arith.addf %100, %101 : vector<1x128xf32>
      %c0_57 = arith.constant 0 : index
      %c0_58 = arith.constant 0 : index
      %c0_59 = arith.constant 0 : index
      %103 = vector.load %arg6[%c0_57, %c0_58, %c0_59] : memref<1x1x128xf32, #tpu.memory_space<vmem>>, vector<1x1x128xf32>
      %104 = vector.shape_cast %103 : vector<1x1x128xf32> to vector<1x128xf32>
      %105 = vector.shape_cast %102 : vector<1x128xf32> to vector<1x1x128xf32>
      tpu.vector_store %arg6[%c0_57, %c0_58, %c0_59], %105 {strides = array<i32>} : memref<1x1x128xf32, #tpu.memory_space<vmem>>, vector<1x1x128xf32>,
    } else {
    }
    return
  }
  func.func @transform_0(%arg0: i32, %arg1: i32, %arg2: i32) -> (i32, i32, i32) {
    %c0_i32 = arith.constant 0 : i32
    %c0_i32_0 = arith.constant 0 : i32
    return %arg0, %c0_i32, %arg2 : i32, i32, i32
  }
  func.func @transform_1(%arg0: i32, %arg1: i32, %arg2: i32) -> (i32, i32, i32) {
    %c0_i32 = arith.constant 0 : i32
    %c0_i32_0 = arith.constant 0 : i32
    return %arg0, %c0_i32, %arg1 : i32, i32, i32
  }
  func.func @transform_2(%arg0: i32, %arg1: i32, %arg2: i32) -> (i32, i32, i32) {
    %c0_i32 = arith.constant 0 : i32
    %c0_i32_0 = arith.constant 0 : i32
    return %arg0, %arg1, %c0_i32 : i32, i32, i32
  }
  func.func @transform_3(%arg0: i32, %arg1: i32, %arg2: i32) -> (i32, i32, i32) {
    %c0_i32 = arith.constant 0 : i32
    %c0_i32_0 = arith.constant 0 : i32
    return %arg0, %c0_i32, %arg1 : i32, i32, i32
  }
}

</mosaic_0001>

<bundles_post_ra>
// kernel: tpu_custom_call.1
= control target key start
LH: loop header
LB: loop body
LE: loop exit
PB: predicated region body
PF: predicated region fallthrough
CT: control target
= control target key end

     0   :  { %8 = vsyncpa [#allocation5], 0  ;;  %s2298_s0 = inlined_call_operand.vmem [shape: f32[2,3,256], index: 0, kind: input, shape index: {}]   ;;  %s2299_s1 = inlined_call_operand.vmem [shape: f32[2,3,256], index: 1, kind: input, shape index: {}]   ;;  %s2300_s2 = inlined_call_operand.vmem [shape: f32[2,256,2], index: 2, kind: input, shape index: {}]   ;;  %s2301_s3 = inlined_call_operand.hbm [shape: f32[2,1,256], index: 3, kind: output, shape index: {}]  }
   0x1   :  { %10 = vsyncpa [#allocation5 + $0x1], 0  ;;  %s1780_s12 = smov 0   ;;  %s1782_s13 = smov 0  }
   0x2   :  { %s1784_s14 = smov 0   ;;  %s1786_s15 = smov 0  }
   0x3   :  { %s1788_s16 = smov 0   ;;  %s1790_s17 = smov 0  }
   0x4   :  { %s1792_s18 = smov 0   ;;  %s1794_s19 = smov 0  }
   0x5   :  { %s1796_s20 = smov 0   ;;  %s1798_s21 = smov 0  }
   0x6 LB: > { %2308 = sst [smem:[#allocation7_spill]] %s1714_s14  ;;  %s1290_s22 = sadd.s32 4294967295, %s1742_s21   ;;  %s1742_s21 = sphi %s1798_s21, %s16_s21   ;;  %s1738_s20 = sphi %s1796_s20, %s2329_s20   ;;  %s1734_s19 = sphi %s1794_s19, %s2328_s19   ;;  %s1730_s18 = sphi %s1792_s18, %s2327_s18   ;;  %s1726_s17 = sphi %s1790_s17, %s2326_s17   ;;  %s1722_s16 = sphi %s1788_s16, %s2325_s16   ;;  %s1718_s15 = sphi %s1786_s15, %s2333_s15   ;;  %s1714_s14 = sphi %s1784_s14, %s2332_s14   ;;  %s1710_s13 = sphi %s1782_s13, %s2331_s13   ;;  %s1706_s12 = sphi %s1780_s12, %s2330_s12  }
   0x7   : > { %2309 = sst [smem:[#allocation8_spill]] %s1730_s18  ;;  %s1291_s23 = sadd.s32 4294967294, %s1742_s21  }
   0x8   : > { %2310 = sst [smem:[#allocation9_spill]] %s1734_s19  ;;  %s28_s24 = sadd.s32 1, %s1730_s18 }
   0x9   : > { %2311 = sst [smem:[#allocation10_spill]] %s1738_s20  ;;  %p29_p0 = scmp.ge.s32.totalorder %s28_s24, 2 }
   0xa   : > { %s31_s25 = sadd.s32 1, %s1734_s19  ;;  %s35_s26 = sadd.s32 1, %s1738_s20 }
   0xb   : > { %p138_p1 = scmp.ne.s32.totalorder %s1714_s14, %s1710_s13  ;;  %s2335_s24 = smov (%p29_p0, %s28_s24), 0 }
   0xc   : > { %2312 = sst [smem:[#allocation11_spill]] %s2335_s24  ;;  %s2337_s25 = smov (!%p29_p0, %s31_s25), %s1734_s19 }
   0xd   : > { %p139_p2 = scmp.eq.s32.totalorder %s1290_s22, 7  ;;  %p144_p3 = scmp.ne.s32.totalorder %s1710_s13, %s1706_s12 }
   0xe   : > { %p33_p4 = scmp.ge.s32.totalorder %s2337_s25, 2  ;;  %p145_p5 = scmp.eq.s32.totalorder %s1291_s23, 7 }
   0xf   : > { %p1842_p6 = por %p139_p2, %p138_p1  ;;  %p1294_p8 = scmp.ge.s32.totalorder %s1742_s21, 1 }
  0x10   : > { %s2339_s25 = smov (%p33_p4, %s2337_s25), 0  ;;  %s2341_s26 = smov (!%p33_p4, %s35_s26), %s1738_s20 }
  0x11   : > { %2314 = sst [smem:[#allocation12_spill]] %s2339_s25  ;;  %p1849_p7 = por %p145_p5, %p144_p3 }
  0x12   : > { %p37_p9 = scmp.ge.s32.totalorder %s2341_s26, 2  ;;  %p198_p10 = scmp.lt.s32.totalorder %s1742_s21, 9 }
  0x13   : > { %s124_s29 = ssub.s32 %s1734_s19, %s2339_s25  ;;  %s128_s5 = sadd.s32 1, %s1714_s14 }
  0x14   : > { %s2343_s26 = smov (%p37_p9, %s2341_s26), 0  ;;  %p199_p11 = pnand %p1294_p8, %p198_p10 }
  0x15   : > { %2316 = sst [smem:[#allocation13_spill]] %s2343_s26  ;;  %s123_s30 = ssub.s32 %s1738_s20, %s2343_s26 }
  0x16   : > { %s125_s4 = sor.u32 %s124_s29, %s123_s30  ;;  %p241_p13 = scmp.lt.s32.totalorder (!%p199_p11), %s1726_s17, 1 }
  0x17   : > { %p126_p12 = scmp.eq.s32.totalorder %s125_s4, 0  ;;  %202 = sbr.rel (%p199_p11) target bundleno = 1797 (0x705), region = 32 }
  0x18   : > { %p243_p0 = scmp.lt.s32.totalorder (!%p199_p11), %s1718_s15, 1  ;;  %p251_p1 = scmp.lt.s32.totalorder (!%p199_p11), %s1722_s16, 1 }
  0x19   : > { %s1863_s6 = scalar_select %p126_p12, %s1714_s14, %s128_s5  }
  0x1a   : > { %s1299_s22 = sshll.u32 (!%p199_p11), %s1722_s16, 4  ;;  %s2318_s29 = sand.u32 (!%p199_p11), 1, %s1710_s13  }
  0x1b   : > { %2317 = sst [smem:[#allocation14_spill]] %s1863_s6  ;;  %p260_p2 = scmp.lt.s32.totalorder (!%p199_p11), %s1299_s22, 31 }
  0x1c   : > { %s242_s8 = scalar_select %p241_p13, %s1726_s17, 1 }
  0x1d   : > { %s244_s9 = scalar_select %p243_p0, %s1718_s15, 1 }
  0x1e   : > { %s1295_s10 = sshll.u32 %s242_s8, 1  ;;  %s1300_s5 = sshll.u32 %s242_s8, 5 }
  0x1f   : > { %s246_s11 = sadd.s32 %s1295_s10, %s244_s9  ;;  %s2345_s22 = smov (!%p260_p2, %s1299_s22), 31 }
  0x20   : > { %s1296_s23 = sshll.u32 %s246_s11, 2  ;;  %s263_s24 = sadd.s32 %s1300_s5, %s2345_s22 }
  0x21   : > { %s1875_s4 = scalar_lea.vmem %s2298_s0, %s1296_s23  ;;  %s1301_s9 = sshll.u32 %s263_s24, 3 }
  0x22   : > { %s252_s26 = scalar_select %p251_p1, %s1722_s16, 1 }
  0x23   : > { %s1886_s14 = scalar_lea.vmem %s2300_s2, %s1301_s9  ;;  %s1890_s23 = scalar_lea.vmem [#allocation4], %s2318_s29 }
  0x24   : > { %s254_s7 = sadd.s32 %s1295_s10, %s252_s26  ;;  %p1302_p3 = scmp.ne.s32.totalorder %s1718_s15, 0 }
  0x25   : > { %s1298_s25 = sshll.u32 %s254_s7, 2 }
  0x26   : > { %s1881_s18 = scalar_lea.vmem %s2299_s1, %s1298_s25  ;;  %271 = sbr.rel (%p1302_p3) target bundleno = 45 (0x2d), region = 36 }
  0x2b   : > { %vm273_vm0 = vcmask 0   ;;  %v1744_v0 = vmov 0.0  }
  0x2c   : > { %272 = vst [vmem:[#allocation2] sm:$0x3] %v1744_v0  ;;  %274 = vst.msk [vmem:[#allocation3] sm:$0x1] %vm273_vm0, %v1744_v0 }
  0x2d PF: > { %v276_v1 = vld [vmem:[%s1875_s4 + $0x1] sm:$0x1]  ;;  %vm426_vm1 = vcmask 1040384   ;;  %v1895_v2 = vld [vmem:[%s1886_s14 + $0x8] sm:$0xff]  ;;  %v1900_v6 = vld [vmem:[%s1886_s14 + $0x10] sm:$0xff]  ;;  %s1745_s19 = smov 127  }
  0x2e   : > { %v427_v3 = vsel %vm426_vm1, %v276_v1, 0.0  ;;  %v277_v4 = vmul.f32 2.0, %v276_v1  ;;  %v298_v5 = vmul.f32 2.0, %v1895_v2  ;;  %v275_v7 = vld [vmem:[%s1875_s4] sm:$0x1]  ;;  %v299_v8 = vmul.f32 2.0, %v1900_v6 }
  0x2f   : > { %428 = vadd.xlane.f32.xlu0 %v427_v3  ;;  %v1905_v9 = vld [vmem:[%s1886_s14 + $0x18] sm:$0xff]  ;;  %v1910_v15 = vld [vmem:[%s1886_s14 + $0x20] sm:$0xff]  ;;  %v1917_v19 = vld [vmem:[%s1886_s14 + $0x28] sm:$0xff]  ;;  %s1968_s20 = sshll.u32 %s1718_s15, 7  ;;  %s1971_s24 = sshll.u32 %s1722_s16, 7  ;;  %vm431_vm2 = vcmask 0  }
  0x30   : > { %v1303_v10 = vadd.f32 -1.0, %v277_v4  ;;  %v1305_v11 = vadd.f32 -1.0, %v298_v5  ;;  %v1306_v13 = vadd.f32 -1.0, %v299_v8  ;;  %v300_v14 = vmul.f32 2.0, %v1905_v9  ;;  %v1922_v22 = vld [vmem:[%s1886_s14] sm:$0xff]  ;;  %v1925_v23 = vld [vmem:[%s1886_s14 + $0x30] sm:$0xff] }
  0x31   : > { %v301_v18 = vmul.f32 2.0, %v1910_v15  ;;  %v302_v21 = vmul.f32 2.0, %v1917_v19  ;;  %v297_v24 = vmul.f32 2.0, %v1922_v22  ;;  %v303_v26 = vmul.f32 2.0, %v1925_v23  ;;  %v1931_v27 = vld [vmem:[%s1886_s14 + $0x40] sm:$0xff]  ;;  %v1934_v28 = vld [vmem:[%s1886_s14 + $0x38] sm:$0xff] }
  0x32   : > { %v279_v12 = vmul.f32 %v1303_v10, %v275_v7  ;;  %347 = vrot.lane.b32.xlu1 %v1305_v11, %s1745_s19  ;;  %v1307_v17 = vadd.f32 -1.0, %v300_v14  ;;  %v305_v30 = vmul.f32 2.0, %v1931_v27  ;;  %v304_v32 = vmul.f32 2.0, %v1934_v28  ;;  %v1940_v33 = vld [vmem:[%s1886_s14 + $0x50] sm:$0xff]  ;;  %v1943_v34 = vld [vmem:[%s1886_s14 + $0x48] sm:$0xff]  ;;  %v1950_v39 = vld [vmem:[%s1886_s14 + $0x60] sm:$0xff] }
  0x33   : > { %v1308_v20 = vadd.f32 -1.0, %v301_v18  ;;  %v1309_v25 = vadd.f32 -1.0, %v302_v21  ;;  %v1304_v29 = vadd.f32 -1.0, %v297_v24  ;;  %v1310_v31 = vadd.f32 -1.0, %v303_v26  ;;  %v1953_v40 = vld [vmem:[%s1886_s14 + $0x58] sm:$0xff]  ;;  %v1960_v45 = vld [vmem:[%s1886_s14 + $0x70] sm:$0xff] }
  0x34   : > { %v1912_v16 = vsub.f32 1.0, %v279_v12  ;;  %v1312_v35 = vadd.f32 -1.0, %v305_v30  ;;  %v307_v36 = vmul.f32 2.0, %v1940_v33  ;;  %v1311_v37 = vadd.f32 -1.0, %v304_v32  ;;  %v1963_v46 = vld [vmem:[%s1886_s14 + $0x68] sm:$0xff]  ;;  %s1429_s25 = sadd.s32 128, %s1968_s20 }
  0x35   : > { %v306_v38 = vmul.f32 2.0, %v1943_v34  ;;  %v309_v42 = vmul.f32 2.0, %v1950_v39  ;;  %v308_v44 = vmul.f32 2.0, %v1953_v40  ;;  %v311_v48 = vmul.f32 2.0, %v1960_v45  ;;  %v433_v51 = vld [vmem:[%s1875_s4 + $0x1] sm:$0x3]  ;;  %p1984_p4 = scmp.le.s32.totalorder %s1429_s25, %s1971_s24  ;;  %p1324_p8 = scmp.gt.s32.totalorder %s1429_s25, %s1971_s24 }
  0x36   : > { %349 = vrot.lane.b32.xlu1 %v1306_v13, %s1745_s19  ;;  %v1314_v41 = vadd.f32 -1.0, %v307_v36  ;;  %v310_v50 = vmul.f32 2.0, %v1963_v46  ;;  %s1431_s26 = sadd.s32 128, %s1971_s24  ;;  %v296_v52 = vld [vmem:[%s1886_s14 + $0x78] sm:$0xff]  ;;  %v1979_v53 = vpack.c.bf16 %v433_v51, %v433_v51  ;;  %v425_v10 = vld [vmem:[#allocation3] sm:$0x1] }
  0x37   : > { %v1313_v43 = vadd.f32 -1.0, %v306_v38  ;;  %v1316_v47 = vadd.f32 -1.0, %v309_v42  ;;  %v1315_v49 = vadd.f32 -1.0, %v308_v44  ;;  %p1991_p5 = scmp.ge.s32.totalorder %s1968_s20, %s1431_s26  ;;  %v1318_v54 = vadd.f32 -1.0, %v311_v48 }
  0x38   : > { %v1317_v55 = vadd.f32 -1.0, %v310_v50  ;;  %v312_v56 = vmul.f32 2.0, %v296_v52 }
  0x3a   : > { %351 = vrot.lane.b32.xlu1 %v1307_v17, %s1745_s19  ;;  %v1319_v57 = vadd.f32 -1.0, %v312_v56 }
  0x3e   : > { %353 = vrot.lane.b32.xlu1 %v1308_v20, %s1745_s19 }
  0x42   : > { %355 = vrot.lane.b32.xlu1 %v1309_v25, %s1745_s19 }
  0x45   : > { %345 = vrot.lane.b32.xlu0 %v1304_v29, %s1745_s19 }
  0x46   : > { %357 = vrot.lane.b32.xlu1 %v1310_v31, %s1745_s19 }
  0x49   : > { %361 = vrot.lane.b32.xlu0 %v1312_v35, %s1745_s19 }
  0x4a   : > { %359 = vrot.lane.b32.xlu1 %v1311_v37, %s1745_s19 }
  0x4d   : > { %365 = vrot.lane.b32.xlu0 %v1314_v41, %s1745_s19 }
  0x4e   : > { %363 = vrot.lane.b32.xlu1 %v1313_v43, %s1745_s19 }
  0x51   : > { %369 = vrot.lane.b32.xlu0 %v1316_v47, %s1745_s19 }
  0x52   : > { %367 = vrot.lane.b32.xlu1 %v1315_v49, %s1745_s19 }
  0x55   : > { %373 = vrot.lane.b32.xlu0 %v1318_v54, %s1745_s19 }
  0x56   : > { %371 = vrot.lane.b32.xlu1 %v1317_v55, %s1745_s19 }
  0x5a   : > { %375 = vrot.lane.b32.xlu1 %v1319_v57, %s1745_s19 }
  0xa4   : > { %v348_v58 = vpop.permute.xlu1 %347 }
  0xa5   : > { %v394_v59 = vmul.f32 %v348_v58, %v1895_v2 }
  0xa7   : > { %v2001_v60 = vsub.f32 1.0, %v394_v59 }
  0xa8   : > { %v350_v61 = vpop.permute.xlu1 %349 }
  0xa9   : > { %v395_v62 = vmul.f32 %v350_v61, %v1900_v6 }
  0xab   : > { %v2004_v63 = vsub.f32 1.0, %v395_v62 }
  0xac   : > { %v352_v0 = vpop.permute.xlu1 %351 }
  0xad   : > { %v396_v1 = vmul.f32 %v352_v0, %v1905_v9 }
  0xaf   : > { %v2007_v3 = vsub.f32 1.0, %v396_v1 }
  0xb0   : > { %v354_v4 = vpop.permute.xlu1 %353 }
  0xb1   : > { %v397_v5 = vmul.f32 %v354_v4, %v1910_v15 }
  0xb3   : > { %v2010_v7 = vsub.f32 1.0, %v397_v5 }
  0xb4   : > { %v356_v8 = vpop.permute.xlu1 %355 }
  0xb5   : > { %v398_v2 = vmul.f32 %v356_v8, %v1917_v19 }
  0xb7   : > { %v2013_v11 = vsub.f32 1.0, %v398_v2 }
  0xb8   : > { %v358_v12 = vpop.permute.xlu1 %357  ;;  %v429_v6 = vpop.xlane.xlu0 %428 }
  0xb9   : > { %v399_v13 = vmul.f32 %v358_v12, %v1925_v23  ;;  %v430_v14 = vadd.f32 %v429_v6, %v425_v10 }
  0xbb   : > { %v2016_v9 = vsub.f32 1.0, %v399_v13  ;;  %432 = vst.msk [vmem:[#allocation3] sm:$0x1] %vm431_vm2, %v430_v14 }
  0xbc   : > { %v360_v17 = vpop.permute.xlu1 %359  ;;  %v346_v18 = vpop.permute.xlu0 %345 }
  0xbd   : > { %v400_v15 = vmul.f32 %v360_v17, %v1934_v28  ;;  %v393_v20 = vmul.f32 %v346_v18, %v1922_v22 }
  0xbf   : > { %v2020_v21 = vsub.f32 1.0, %v400_v15  ;;  %v2022_v19 = vsub.f32 1.0, %v393_v20 }
  0xc0   : > { %v364_v24 = vpop.permute.xlu1 %363  ;;  %v362_v25 = vpop.permute.xlu0 %361 }
  0xc1   : > { %v402_v26 = vmul.f32 %v364_v24, %v1943_v34  ;;  %v401_v23 = vmul.f32 %v362_v25, %v1931_v27 }
  0xc3   : > { %v2026_v29 = vsub.f32 1.0, %v402_v26  ;;  %v2028_v30 = vsub.f32 1.0, %v401_v23 }
  0xc4   : > { %v368_v31 = vpop.permute.xlu1 %367  ;;  %v366_v32 = vpop.permute.xlu0 %365 }
  0xc5   : > { %v404_v28 = vmul.f32 %v368_v31, %v1953_v40  ;;  %v403_v22 = vmul.f32 %v366_v32, %v1940_v33 }
  0xc7   : > { %v2032_v35 = vsub.f32 1.0, %v404_v28  ;;  %v2034_v36 = vsub.f32 1.0, %v403_v22 }
  0xc8   : > { %v372_v37 = vpop.permute.xlu1 %371  ;;  %v370_v38 = vpop.permute.xlu0 %369 }
  0xc9   : > { %v406_v34 = vmul.f32 %v372_v37, %v1963_v46  ;;  %v405_v27 = vmul.f32 %v370_v38, %v1950_v39 }
  0xcb   : > { %v2038_v41 = vsub.f32 1.0, %v406_v34  ;;  %v2040_v42 = vsub.f32 1.0, %v405_v27  ;;  %445 = sbr.rel (%p1324_p8) target bundleno = 602 (0x25a), region = 40 }
  0xcc   : > { %v376_v43 = vpop.permute.xlu1 %375  ;;  %v374_v44 = vpop.permute.xlu0 %373 }
  0xcd   : > { %v408_v47 = vmul.f32 %v376_v43, %v296_v52  ;;  %v407_v40 = vmul.f32 %v374_v44, %v1960_v45 }
  0xcf   : > { %v2043_v33 = vsub.f32 1.0, %v408_v47  ;;  %v2045_v48 = vsub.f32 1.0, %v407_v40 }
  0xd0   : > { %v1746_v46 = vmov 0   ;;  %v1747_v39 = vmov 0.0   ;;  %vm1748_vm3 = vmmov 0   ;;  %v446_v45 = vlaneseq  ;;  %v586_v6 = vld [vmem:[#allocation2] sm:$0x3] }
  0xd1   : > { %1624 = vset.pattern.permute.xlu1 %v1746_v46  ;;  %1623 = vset.pattern.permute.xlu0 %v1746_v46  ;;  %v1749_v56 = vmov 1.0|1.0  }
  0xd2   : > { %512 = vperm.xlu1 %1624, %v2040_v42   ;;  %522 = vperm.xlu0 %1623, %v2045_v48   ;;  %v447_v49 = vshrl.u32 %v446_v45, 7 }
  0xd3   : > { %1459 = vmatprep.subr.bf16.mxu0 %v1747_v39  ;;  %1475 = vmatprep.mubr.msk.bf16.mxu0 %vm1748_vm3, %v1747_v39 }
  0xd4   : > { %v448_v50 = vsub.s32 0, %v447_v49 }
  0xd6   : > { %517 = vperm.xlu1 %1624, %v2038_v41   ;;  %527 = vperm.xlu0 %1623, %v2043_v33   ;;  %v449_v52 = vrot.slane %v1912_v16, %v448_v50 }
  0xda   : > { %507 = vperm.xlu1 %1624, %v2032_v35   ;;  %502 = vperm.xlu0 %1623, %v2034_v36  }
  0xde   : > { %497 = vperm.xlu1 %1624, %v2026_v29   ;;  %492 = vperm.xlu0 %1623, %v2028_v30  }
  0xe2   : > { %487 = vperm.xlu1 %1624, %v2020_v21   ;;  %482 = vperm.xlu0 %1623, %v2016_v9  }
  0xe6   : > { %477 = vperm.xlu1 %1624, %v2013_v11   ;;  %472 = vperm.xlu0 %1623, %v2010_v7  }
  0xea   : > { %467 = vperm.xlu1 %1624, %v2007_v3   ;;  %462 = vperm.xlu0 %1623, %v2004_v63  }
  0xee   : > { %457 = vperm.xlu1 %1624, %v2001_v60   ;;  %452 = vperm.xlu0 %1623, %v2022_v19  }
 0x14d   : > { %v523_v51 = vpop.permute.xlu0 %522  ;;  %v513_v55 = vpop.permute.xlu1 %512 }
 0x14e   : > { %vm544_vm5 = vcmp.ge.f32.partialorder %v449_v52, %v523_v51  ;;  %vm542_vm7 = vcmp.ge.f32.partialorder %v449_v52, %v513_v55 }
 0x151   : > { %v528_v54 = vpop.permute.xlu0 %527  ;;  %v518_v57 = vpop.permute.xlu1 %517 }
 0x152   : > { %vm545_vm4 = vcmp.ge.f32.partialorder %v449_v52, %v528_v54  ;;  %vm543_vm8 = vcmp.ge.f32.partialorder %v449_v52, %v518_v57 }
 0x153   : > { %vm1341_vm6 = vmpackc.low %vm545_vm4, %vm544_vm5 }
 0x154   : > { %1460 = vmatpush3.bf16.xpose.msk.msra.mxu0 %vm1341_vm6, %v1749_v56  ;;  %vm1343_vm9 = vmpackc.low %vm543_vm8, %vm542_vm7 }
 0x155   : > { %1461 = vmatprep.subr.bf16.mxu0 %v1747_v39  ;;  %v508_v58 = vpop.permute.xlu1 %507  ;;  %v503_v59 = vpop.permute.xlu0 %502 }
 0x156   : > { %vm541_vm10 = vcmp.ge.f32.partialorder %v449_v52, %v508_v58  ;;  %vm540_vm11 = vcmp.ge.f32.partialorder %v449_v52, %v503_v59 }
 0x157   : > { %vm1345_vm12 = vmpackc.low %vm541_vm10, %vm540_vm11 }
 0x159   : > { %v498_v61 = vpop.permute.xlu1 %497  ;;  %v493_v62 = vpop.permute.xlu0 %492 }
 0x15a   : > { %vm539_vm13 = vcmp.ge.f32.partialorder %v449_v52, %v498_v61  ;;  %vm538_vm14 = vcmp.ge.f32.partialorder %v449_v52, %v493_v62 }
 0x15b   : > { %vm1347_vm15 = vmpackc.low %vm539_vm13, %vm538_vm14 }
 0x15c   : > { %1462 = vmatpush3.bf16.xpose.msk.msra.mxu0 %vm1343_vm9, %v1749_v56 }
 0x15d   : > { %1463 = vmatprep.subr.bf16.mxu0 %v1747_v39  ;;  %v488_v0 = vpop.permute.xlu1 %487  ;;  %v483_v1 = vpop.permute.xlu0 %482 }
 0x15e   : > { %vm537_vm0 = vcmp.ge.f32.partialorder %v449_v52, %v488_v0  ;;  %vm536_vm2 = vcmp.ge.f32.partialorder %v449_v52, %v483_v1 }
 0x15f   : > { %vm1349_vm3 = vmpackc.low %vm537_vm0, %vm536_vm2 }
 0x161   : > { %v478_v4 = vpop.permute.xlu1 %477  ;;  %v473_v5 = vpop.permute.xlu0 %472 }
 0x162   : > { %vm535_vm4 = vcmp.ge.f32.partialorder %v449_v52, %v478_v4  ;;  %vm534_vm5 = vcmp.ge.f32.partialorder %v449_v52, %v473_v5 }
 0x163   : > { %vm1351_vm6 = vmpackc.low %vm535_vm4, %vm534_vm5 }
 0x164   : > { %1464 = vmatpush3.bf16.xpose.msk.msra.mxu0 %vm1345_vm12, %v1749_v56 }
 0x165   : > { %1465 = vmatprep.subr.bf16.mxu0 %v1747_v39  ;;  %v468_v8 = vpop.permute.xlu1 %467  ;;  %v463_v2 = vpop.permute.xlu0 %462 }
 0x166   : > { %vm533_vm7 = vcmp.ge.f32.partialorder %v449_v52, %v468_v8  ;;  %vm532_vm8 = vcmp.ge.f32.partialorder %v449_v52, %v463_v2 }
 0x167   : > { %vm1353_vm9 = vmpackc.low %vm533_vm7, %vm532_vm8 }
 0x169   : > { %v458_v10 = vpop.permute.xlu1 %457  ;;  %v453_v12 = vpop.permute.xlu0 %452 }
 0x16a   : > { %vm531_vm10 = vcmp.ge.f32.partialorder %v449_v52, %v458_v10  ;;  %vm530_vm11 = vcmp.ge.f32.partialorder %v449_v52, %v453_v12 }
 0x16b   : > { %vm1355_vm12 = vmpackc.low %vm531_vm10, %vm530_vm11 }
 0x16c   : > { %1466 = vmatpush3.bf16.xpose.msk.msra.mxu0 %vm1347_vm15, %v1749_v56 }
 0x16d   : > { %1467 = vmatprep.subr.bf16.mxu0 %v1747_v39 }
 0x174   : > { %1468 = vmatpush3.bf16.xpose.msk.msra.mxu0 %vm1349_vm3, %v1749_v56 }
 0x175   : > { %1469 = vmatprep.subr.bf16.mxu0 %v1747_v39 }
 0x17c   : > { %1470 = vmatpush3.bf16.xpose.msk.msra.mxu0 %vm1351_vm6, %v1749_v56 }
 0x17d   : > { %1471 = vmatprep.subr.bf16.mxu0 %v1747_v39 }
 0x184   : > { %1472 = vmatpush3.bf16.xpose.msk.msra.mxu0 %vm1353_vm9, %v1749_v56 }
 0x185   : > { %1473 = vmatprep.subr.bf16.mxu0 %v1747_v39 }
 0x18c   : > { %1474 = vmatpush3.bf16.xpose.msk.msra.mxu0 %vm1355_vm12, %v1749_v56 }
 0x193   : > { %1476 = vmatmul.mubr.bf16.vlgmr.msra.gmra.mxu0 %v1979_v53 }
 0x253   : > { %v621_v13 = vpop.f32.mrf.mxu0 }
 0x254   : > { %v627_v14 = vadd.f32 %v621_v13, %v586_v6 }
 0x255   : > { %v1477_v17 = vpop.f32.mrf.mxu0 }
 0x256   : > { %628 = vst [vmem:[#allocation2] sm:$0x3] %v627_v14 }
 0x257   : > { %v624_v18 = vpop.f32.mrf.mxu0 }
 0x259   : > { %v1478_v15 = vpop.f32.mrf.mxu0 }
 0x25a PF: > { %p1357_p9 = scmp.lt.s32.totalorder %s1968_s20, %s1431_s26 }
 0x25c   : > { %631 = sbr.rel (%p1357_p9) target bundleno = 1003 (0x3eb), region = 44 }
 0x261   : > { %v1750_v20 = vmov 0   ;;  %v1751_v24 = vmov 0.0   ;;  %vm1752_vm13 = vmmov 0   ;;  %v632_v25 = vlaneseq  ;;  %v772_v52 = vld [vmem:[#allocation2] sm:$0x3] }
 0x262   : > { %1626 = vset.pattern.permute.xlu1 %v1750_v20  ;;  %1625 = vset.pattern.permute.xlu0 %v1750_v20  ;;  %v1753_v37 = vmov 1.0|1.0  }
 0x263   : > { %698 = vperm.xlu1 %1626, %v2040_v42   ;;  %708 = vperm.xlu0 %1625, %v2045_v48   ;;  %v633_v26 = vshrl.u32 %v632_v25, 7 }
 0x264   : > { %1479 = vmatprep.subr.bf16.mxu0 %v1751_v24  ;;  %1495 = vmatprep.mubr.msk.bf16.mxu0 %vm1752_vm13, %v1751_v24 }
 0x265   : > { %v634_v23 = vsub.s32 0, %v633_v26 }
 0x267   : > { %703 = vperm.xlu1 %1626, %v2038_v41   ;;  %713 = vperm.xlu0 %1625, %v2043_v33   ;;  %v635_v32 = vrot.slane %v1912_v16, %v634_v23 }
 0x26b   : > { %693 = vperm.xlu1 %1626, %v2032_v35   ;;  %688 = vperm.xlu0 %1625, %v2034_v36  }
 0x26f   : > { %683 = vperm.xlu1 %1626, %v2026_v29   ;;  %678 = vperm.xlu0 %1625, %v2028_v30  }
 0x273   : > { %673 = vperm.xlu1 %1626, %v2020_v21   ;;  %668 = vperm.xlu0 %1625, %v2016_v9  }
 0x277   : > { %663 = vperm.xlu1 %1626, %v2013_v11   ;;  %658 = vperm.xlu0 %1625, %v2010_v7  }
 0x27b   : > { %653 = vperm.xlu1 %1626, %v2007_v3   ;;  %648 = vperm.xlu0 %1625, %v2004_v63  }
 0x27f   : > { %643 = vperm.xlu1 %1626, %v2001_v60   ;;  %638 = vperm.xlu0 %1625, %v2022_v19  }
 0x2de   : > { %v709_v31 = vpop.permute.xlu0 %708  ;;  %v699_v22 = vpop.permute.xlu1 %698 }
 0x2df   : > { %vm730_vm15 = vcmp.gt.f32.partialorder %v635_v32, %v709_v31  ;;  %vm728_vm2 = vcmp.gt.f32.partialorder %v635_v32, %v699_v22 }
 0x2e2   : > { %v714_v28 = vpop.permute.xlu0 %713  ;;  %v704_v38 = vpop.permute.xlu1 %703 }
 0x2e3   : > { %vm731_vm14 = vcmp.gt.f32.partialorder %v635_v32, %v714_v28  ;;  %vm729_vm3 = vcmp.gt.f32.partialorder %v635_v32, %v704_v38 }
 0x2e4   : > { %vm1374_vm0 = vmpackc.low %vm731_vm14, %vm730_vm15 }
 0x2e5   : > { %1480 = vmatpush3.bf16.xpose.msk.msra.mxu0 %vm1374_vm0, %v1753_v37  ;;  %vm1376_vm4 = vmpackc.low %vm729_vm3, %vm728_vm2 }
 0x2e6   : > { %1481 = vmatprep.subr.bf16.mxu0 %v1751_v24  ;;  %v694_v34 = vpop.permute.xlu1 %693  ;;  %v689_v27 = vpop.permute.xlu0 %688 }
 0x2e7   : > { %vm727_vm5 = vcmp.gt.f32.partialorder %v635_v32, %v694_v34  ;;  %vm726_vm6 = vcmp.gt.f32.partialorder %v635_v32, %v689_v27 }
 0x2e8   : > { %vm1378_vm7 = vmpackc.low %vm727_vm5, %vm726_vm6 }
 0x2ea   : > { %v684_v43 = vpop.permute.xlu1 %683  ;;  %v679_v44 = vpop.permute.xlu0 %678 }
 0x2eb   : > { %vm725_vm8 = vcmp.gt.f32.partialorder %v635_v32, %v684_v43  ;;  %vm724_vm9 = vcmp.gt.f32.partialorder %v635_v32, %v679_v44 }
 0x2ec   : > { %vm1380_vm10 = vmpackc.low %vm725_vm8, %vm724_vm9 }
 0x2ed   : > { %1482 = vmatpush3.bf16.xpose.msk.msra.mxu0 %vm1376_vm4, %v1753_v37 }
 0x2ee   : > { %1483 = vmatprep.subr.bf16.mxu0 %v1751_v24  ;;  %v674_v47 = vpop.permute.xlu1 %673  ;;  %v669_v40 = vpop.permute.xlu0 %668 }
 0x2ef   : > { %vm723_vm11 = vcmp.gt.f32.partialorder %v635_v32, %v674_v47  ;;  %vm722_vm12 = vcmp.gt.f32.partialorder %v635_v32, %v669_v40 }
 0x2f0   : > { %vm1382_vm13 = vmpackc.low %vm723_vm11, %vm722_vm12 }
 0x2f2   : > { %v664_v46 = vpop.permute.xlu1 %663  ;;  %v659_v39 = vpop.permute.xlu0 %658 }
 0x2f3   : > { %vm721_vm14 = vcmp.gt.f32.partialorder %v635_v32, %v664_v46  ;;  %vm720_vm15 = vcmp.gt.f32.partialorder %v635_v32, %v659_v39 }
 0x2f4   : > { %vm1384_vm0 = vmpackc.low %vm721_vm14, %vm720_vm15 }
 0x2f5   : > { %1484 = vmatpush3.bf16.xpose.msk.msra.mxu0 %vm1378_vm7, %v1753_v37 }
 0x2f6   : > { %1485 = vmatprep.subr.bf16.mxu0 %v1751_v24  ;;  %v654_v45 = vpop.permute.xlu1 %653  ;;  %v649_v49 = vpop.permute.xlu0 %648 }
 0x2f7   : > { %vm719_vm2 = vcmp.gt.f32.partialorder %v635_v32, %v654_v45  ;;  %vm718_vm3 = vcmp.gt.f32.partialorder %v635_v32, %v649_v49 }
 0x2f8   : > { %vm1386_vm4 = vmpackc.low %vm719_vm2, %vm718_vm3 }
 0x2fa   : > { %v644_v50 = vpop.permute.xlu1 %643  ;;  %v639_v51 = vpop.permute.xlu0 %638 }
 0x2fb   : > { %vm717_vm5 = vcmp.gt.f32.partialorder %v635_v32, %v644_v50  ;;  %vm716_vm6 = vcmp.gt.f32.partialorder %v635_v32, %v639_v51 }
 0x2fc   : > { %vm1388_vm7 = vmpackc.low %vm717_vm5, %vm716_vm6 }
 0x2fd   : > { %1486 = vmatpush3.bf16.xpose.msk.msra.mxu0 %vm1380_vm10, %v1753_v37 }
 0x2fe   : > { %1487 = vmatprep.subr.bf16.mxu0 %v1751_v24 }
 0x305   : > { %1488 = vmatpush3.bf16.xpose.msk.msra.mxu0 %vm1382_vm13, %v1753_v37 }
 0x306   : > { %1489 = vmatprep.subr.bf16.mxu0 %v1751_v24 }
 0x30d   : > { %1490 = vmatpush3.bf16.xpose.msk.msra.mxu0 %vm1384_vm0, %v1753_v37 }
 0x30e   : > { %1491 = vmatprep.subr.bf16.mxu0 %v1751_v24 }
 0x315   : > { %1492 = vmatpush3.bf16.xpose.msk.msra.mxu0 %vm1386_vm4, %v1753_v37 }
 0x316   : > { %1493 = vmatprep.subr.bf16.mxu0 %v1751_v24 }
 0x31d   : > { %1494 = vmatpush3.bf16.xpose.msk.msra.mxu0 %vm1388_vm7, %v1753_v37 }
 0x324   : > { %1496 = vmatmul.mubr.bf16.vlgmr.msra.gmra.mxu0 %v1979_v53 }
 0x3e4   : > { %v807_v54 = vpop.f32.mrf.mxu0 }
 0x3e5   : > { %v813_v55 = vadd.f32 %v807_v54, %v772_v52 }
 0x3e6   : > { %v1497_v56 = vpop.f32.mrf.mxu0 }
 0x3e7   : > { %814 = vst [vmem:[#allocation2] sm:$0x3] %v813_v55 }
 0x3e8   : > { %v810_v57 = vpop.f32.mrf.mxu0 }
 0x3ea   : > { %v1498_v58 = vpop.f32.mrf.mxu0 }
 0x3eb PF: > { %p815_p10 = por %p1991_p5, %p1984_p4 }
 0x3ed   : > { %818 = sbr.rel (%p815_p10) target bundleno = 1406 (0x57e), region = 48 }
 0x3f2   : > { %v1754_v59 = vmov 0   ;;  %v1755_v61 = vmov 0.0   ;;  %vm1756_vm8 = vmmov 0   ;;  %v1757_v8 = vmov 1.0|1.0  }
 0x3f3   : > { %1628 = vset.pattern.permute.xlu1 %v1754_v59  ;;  %1627 = vset.pattern.permute.xlu0 %v1754_v59  ;;  %v1061_v54 = vld [vmem:[#allocation2] sm:$0x3] }
 0x3f4   : > { %923 = vperm.xlu1 %1628, %v2040_v42   ;;  %933 = vperm.xlu0 %1627, %v2045_v48  }
 0x3f5   : > { %1499 = vmatprep.subr.bf16.mxu0 %v1755_v61  ;;  %1515 = vmatprep.mubr.msk.bf16.mxu0 %vm1756_vm8, %v1755_v61 }
 0x3f8   : > { %928 = vperm.xlu1 %1628, %v2038_v41   ;;  %938 = vperm.xlu0 %1627, %v2043_v33  }
 0x3fc   : > { %918 = vperm.xlu1 %1628, %v2032_v35   ;;  %913 = vperm.xlu0 %1627, %v2034_v36  }
 0x400   : > { %908 = vperm.xlu1 %1628, %v2026_v29   ;;  %903 = vperm.xlu0 %1627, %v2028_v30  }
 0x404   : > { %898 = vperm.xlu1 %1628, %v2020_v21   ;;  %893 = vperm.xlu0 %1627, %v2016_v9   ;;  %v819_v21 = vlaneseq }
 0x406   : > { %v2129_v29 = vshrl.u32 %v819_v21, 7  ;;  %v854_v30 = vand.u32 127, %v819_v21 }
 0x408   : > { %888 = vperm.xlu1 %1628, %v2013_v11   ;;  %883 = vperm.xlu0 %1627, %v2010_v7   ;;  %v835_v9 = vadd.s32 120, %v2129_v29  ;;  %v859_v11 = vsub.s32 0, %v2129_v29  ;;  %v834_v7 = vadd.s32 112, %v2129_v29  ;;  %v832_v33 = vadd.s32 96, %v2129_v29 }
 0x409   : > { %v833_v48 = vadd.s32 104, %v2129_v29  ;;  %v831_v4 = vadd.s32 88, %v2129_v29  ;;  %v830_v5 = vadd.s32 80, %v2129_v29  ;;  %v829_v13 = vadd.s32 72, %v2129_v29 }
 0x40a   : > { %v2142_v36 = vrot.slane %v1912_v16, %v859_v11  ;;  %v828_v14 = vadd.s32 64, %v2129_v29  ;;  %v827_v24 = vadd.s32 56, %v2129_v29  ;;  %v826_v25 = vadd.s32 48, %v2129_v29 }
 0x40b   : > { %v825_v28 = vadd.s32 40, %v2129_v29  ;;  %v824_v22 = vadd.s32 32, %v2129_v29  ;;  %v823_v43 = vadd.s32 24, %v2129_v29  ;;  %v822_v44 = vadd.s32 16, %v2129_v29 }
 0x40c   : > { %878 = vperm.xlu1 %1628, %v2007_v3   ;;  %873 = vperm.xlu0 %1627, %v2004_v63   ;;  %v2135_v3 = vstv %s1971_s24  ;;  %v855_v63 = vstv %s1968_s20  ;;  %v821_v45 = vadd.s32 8, %v2129_v29 }
 0x40d   : > { %v851_v41 = vadd.s32 %v2135_v3, %v834_v7  ;;  %v849_v16 = vadd.s32 %v2135_v3, %v832_v33  ;;  %v850_v0 = vadd.s32 %v2135_v3, %v833_v48  ;;  %v848_v2 = vadd.s32 %v2135_v3, %v831_v4 }
 0x40e   : > { %v847_v12 = vadd.s32 %v2135_v3, %v830_v5  ;;  %v846_v17 = vadd.s32 %v2135_v3, %v829_v13  ;;  %v845_v15 = vadd.s32 %v2135_v3, %v828_v14  ;;  %v844_v26 = vadd.s32 %v2135_v3, %v827_v24 }
 0x40f   : > { %v843_v31 = vadd.s32 %v2135_v3, %v826_v25  ;;  %v842_v37 = vadd.s32 %v2135_v3, %v825_v28  ;;  %v841_v34 = vadd.s32 %v2135_v3, %v824_v22  ;;  %v840_v47 = vadd.s32 %v2135_v3, %v823_v43 }
 0x410   : > { %868 = vperm.xlu1 %1628, %v2001_v60   ;;  %863 = vperm.xlu0 %1627, %v2022_v19   ;;  %v852_v60 = vadd.s32 %v2135_v3, %v835_v9  ;;  %v2139_v19 = vadd.s32 %v855_v63, %v854_v30  ;;  %v839_v46 = vadd.s32 %v2135_v3, %v822_v44 }
 0x411   : > { %v838_v49 = vadd.s32 %v2135_v3, %v821_v45  ;;  %v837_v51 = vadd.s32 %v2135_v3, %v2129_v29 }
 0x412   : > { %vm988_vm10 = vcmp.lt.s32.totalorder %v2139_v19, %v852_v60  ;;  %vm987_vm12 = vcmp.lt.s32.totalorder %v2139_v19, %v851_v41  ;;  %vm985_vm4 = vcmp.lt.s32.totalorder %v2139_v19, %v849_v16  ;;  %vm986_vm7 = vcmp.lt.s32.totalorder %v2139_v19, %v850_v0 }
 0x46f   : > { %v934_v35 = vpop.permute.xlu0 %933  ;;  %v924_v62 = vpop.permute.xlu1 %923 }
 0x470   : > { %vm971_vm11 = vcmp.eq.f32.partialorder %v2142_v36, %v934_v35  ;;  %vm955_vm15 = vcmp.gt.f32.partialorder %v2142_v36, %v934_v35  ;;  %vm969_vm3 = vcmp.eq.f32.partialorder %v2142_v36, %v924_v62 }
 0x471   : > { %vm1003_vm0 = vmand %vm971_vm11, %vm987_vm12 }
 0x472   : > { %vm1019_vm5 = vmor %vm955_vm15, %vm1003_vm0  ;;  %vm984_vm0 = vcmp.lt.s32.totalorder %v2139_v19, %v848_v2 }
 0x473   : > { %v939_v42 = vpop.permute.xlu0 %938  ;;  %v929_v1 = vpop.permute.xlu1 %928 }
 0x474   : > { %vm972_vm9 = vcmp.eq.f32.partialorder %v2142_v36, %v939_v42  ;;  %vm956_vm13 = vcmp.gt.f32.partialorder %v2142_v36, %v939_v42  ;;  %vm970_vm6 = vcmp.eq.f32.partialorder %v2142_v36, %v929_v1  ;;  %vm954_vm11 = vcmp.gt.f32.partialorder %v2142_v36, %v929_v1 }
 0x475   : > { %vm1004_vm14 = vmand %vm972_vm9, %vm988_vm10  ;;  %vm953_vm9 = vcmp.gt.f32.partialorder %v2142_v36, %v924_v62 }
 0x476   : > { %vm1020_vm2 = vmor %vm956_vm13, %vm1004_vm14 }
 0x477   : > { %vm1406_vm8 = vmpackc.low %vm1020_vm2, %vm1019_vm5  ;;  %v919_v10 = vpop.permute.xlu1 %918  ;;  %v914_v6 = vpop.permute.xlu0 %913 }
 0x478   : > { %1500 = vmatpush3.bf16.xpose.msk.msra.mxu0 %vm1406_vm8, %v1757_v8  ;;  %vm1001_vm10 = vmand %vm969_vm3, %vm985_vm4  ;;  %vm968_vm15 = vcmp.eq.f32.partialorder %v2142_v36, %v919_v10  ;;  %vm967_vm2 = vcmp.eq.f32.partialorder %v2142_v36, %v914_v6  ;;  %vm983_vm3 = vcmp.lt.s32.totalorder %v2139_v19, %v847_v12  ;;  %vm952_vm5 = vcmp.gt.f32.partialorder %v2142_v36, %v919_v10 }
 0x479   : > { %1501 = vmatprep.subr.bf16.mxu0 %v1755_v61  ;;  %vm1002_vm12 = vmand %vm970_vm6, %vm986_vm7  ;;  %vm951_vm7 = vcmp.gt.f32.partialorder %v2142_v36, %v914_v6 }
 0x47a   : > { %vm1017_vm13 = vmor %vm953_vm9, %vm1001_vm10 }
 0x47b   : > { %vm1018_vm14 = vmor %vm954_vm11, %vm1002_vm12  ;;  %v909_v18 = vpop.permute.xlu1 %908  ;;  %v904_v20 = vpop.permute.xlu0 %903  ;;  %vm982_vm12 = vcmp.lt.s32.totalorder %v2139_v19, %v846_v17 }
 0x47c   : > { %vm1408_vm4 = vmpackc.low %vm1018_vm14, %vm1017_vm13  ;;  %vm966_vm11 = vcmp.eq.f32.partialorder %v2142_v36, %v909_v18  ;;  %vm965_vm13 = vcmp.eq.f32.partialorder %v2142_v36, %v904_v20  ;;  %vm981_vm14 = vcmp.lt.s32.totalorder %v2139_v19, %v845_v15 }
 0x47d   : > { %vm1000_vm6 = vmand %vm968_vm15, %vm984_vm0  ;;  %vm950_vm0 = vcmp.gt.f32.partialorder %v2142_v36, %v909_v18 }
 0x47e   : > { %vm999_vm8 = vmand %vm967_vm2, %vm983_vm3  ;;  %vm949_vm3 = vcmp.gt.f32.partialorder %v2142_v36, %v904_v20 }
 0x47f   : > { %vm1016_vm9 = vmor %vm952_vm5, %vm1000_vm6  ;;  %v899_v23 = vpop.permute.xlu1 %898  ;;  %v894_v32 = vpop.permute.xlu0 %893 }
 0x480   : > { %1502 = vmatpush3.bf16.xpose.msk.msra.mxu0 %vm1408_vm4, %v1757_v8  ;;  %vm1015_vm10 = vmor %vm951_vm7, %vm999_vm8  ;;  %vm964_vm7 = vcmp.eq.f32.partialorder %v2142_v36, %v899_v23  ;;  %vm980_vm8 = vcmp.lt.s32.totalorder %v2139_v19, %v844_v26 }
 0x481   : > { %1503 = vmatprep.subr.bf16.mxu0 %v1755_v61  ;;  %vm1410_vm15 = vmpackc.low %vm1016_vm9, %vm1015_vm10  ;;  %vm963_vm9 = vcmp.eq.f32.partialorder %v2142_v36, %v894_v32  ;;  %vm979_vm10 = vcmp.lt.s32.totalorder %v2139_v19, %v843_v31 }
 0x482   : > { %vm998_vm2 = vmand %vm966_vm11, %vm982_vm12  ;;  %vm948_vm12 = vcmp.gt.f32.partialorder %v2142_v36, %v899_v23 }
 0x483   : > { %vm997_vm4 = vmand %vm965_vm13, %vm981_vm14  ;;  %vm947_vm14 = vcmp.gt.f32.partialorder %v2142_v36, %v894_v32  ;;  %v889_v38 = vpop.permute.xlu1 %888  ;;  %v884_v27 = vpop.permute.xlu0 %883 }
 0x484   : > { %vm1014_vm5 = vmor %vm950_vm0, %vm998_vm2 }
 0x485   : > { %vm1013_vm6 = vmor %vm949_vm3, %vm997_vm4  ;;  %vm962_vm3 = vcmp.eq.f32.partialorder %v2142_v36, %v889_v38  ;;  %vm978_vm4 = vcmp.lt.s32.totalorder %v2139_v19, %v842_v37 }
 0x486   : > { %vm1412_vm11 = vmpackc.low %vm1014_vm5, %vm1013_vm6  ;;  %vm961_vm5 = vcmp.eq.f32.partialorder %v2142_v36, %v884_v27  ;;  %vm977_vm6 = vcmp.lt.s32.totalorder %v2139_v19, %v841_v34 }
 0x487   : > { %vm996_vm13 = vmand %vm964_vm7, %vm980_vm8  ;;  %vm946_vm8 = vcmp.gt.f32.partialorder %v2142_v36, %v889_v38  ;;  %v879_v40 = vpop.permute.xlu1 %878  ;;  %v874_v39 = vpop.permute.xlu0 %873 }
 0x488   : > { %1504 = vmatpush3.bf16.xpose.msk.msra.mxu0 %vm1410_vm15, %v1757_v8  ;;  %vm995_vm15 = vmand %vm963_vm9, %vm979_vm10  ;;  %vm945_vm10 = vcmp.gt.f32.partialorder %v2142_v36, %v884_v27 }
 0x489   : > { %1505 = vmatprep.subr.bf16.mxu0 %v1755_v61  ;;  %vm1012_vm0 = vmor %vm948_vm12, %vm996_vm13 }
 0x48a   : > { %vm1011_vm2 = vmor %vm947_vm14, %vm995_vm15  ;;  %vm960_vm14 = vcmp.eq.f32.partialorder %v2142_v36, %v879_v40  ;;  %vm976_vm15 = vcmp.lt.s32.totalorder %v2139_v19, %v840_v47 }
 0x48b   : > { %vm1414_vm7 = vmpackc.low %vm1012_vm0, %vm1011_vm2  ;;  %vm959_vm0 = vcmp.eq.f32.partialorder %v2142_v36, %v874_v39  ;;  %vm975_vm2 = vcmp.lt.s32.totalorder %v2139_v19, %v839_v46  ;;  %v869_v50 = vpop.permute.xlu1 %868  ;;  %v864_v52 = vpop.permute.xlu0 %863 }
 0x48c   : > { %vm994_vm9 = vmand %vm962_vm3, %vm978_vm4  ;;  %vm944_vm4 = vcmp.gt.f32.partialorder %v2142_v36, %v879_v40 }
 0x48d   : > { %vm1010_vm12 = vmor %vm946_vm8, %vm994_vm9 }
 0x490   : > { %1506 = vmatpush3.bf16.xpose.msk.msra.mxu0 %vm1412_vm11, %v1757_v8  ;;  %vm993_vm11 = vmand %vm961_vm5, %vm977_vm6  ;;  %vm943_vm6 = vcmp.gt.f32.partialorder %v2142_v36, %v874_v39 }
 0x491   : > { %1507 = vmatprep.subr.bf16.mxu0 %v1755_v61  ;;  %vm1009_vm13 = vmor %vm945_vm10, %vm993_vm11  ;;  %vm958_vm10 = vcmp.eq.f32.partialorder %v2142_v36, %v869_v50  ;;  %vm974_vm11 = vcmp.lt.s32.totalorder %v2139_v19, %v838_v49 }
 0x492   : > { %vm1416_vm3 = vmpackc.low %vm1010_vm12, %vm1009_vm13  ;;  %vm957_vm12 = vcmp.eq.f32.partialorder %v2142_v36, %v864_v52  ;;  %vm973_vm13 = vcmp.lt.s32.totalorder %v2139_v19, %v837_v51 }
 0x493   : > { %vm992_vm5 = vmand %vm960_vm14, %vm976_vm15  ;;  %vm942_vm15 = vcmp.gt.f32.partialorder %v2142_v36, %v869_v50 }
 0x494   : > { %vm1008_vm8 = vmor %vm944_vm4, %vm992_vm5 }
 0x498   : > { %1508 = vmatpush3.bf16.xpose.msk.msra.mxu0 %vm1414_vm7, %v1757_v8  ;;  %vm991_vm7 = vmand %vm959_vm0, %vm975_vm2  ;;  %vm941_vm2 = vcmp.gt.f32.partialorder %v2142_v36, %v864_v52 }
 0x499   : > { %1509 = vmatprep.subr.bf16.mxu0 %v1755_v61  ;;  %vm1007_vm9 = vmor %vm943_vm6, %vm991_vm7 }
 0x49a   : > { %vm1418_vm14 = vmpackc.low %vm1008_vm8, %vm1007_vm9 }
 0x49b   : > { %vm990_vm0 = vmand %vm958_vm10, %vm974_vm11 }
 0x49c   : > { %vm1006_vm4 = vmor %vm942_vm15, %vm990_vm0 }
 0x4a0   : > { %1510 = vmatpush3.bf16.xpose.msk.msra.mxu0 %vm1416_vm3, %v1757_v8  ;;  %vm989_vm3 = vmand %vm957_vm12, %vm973_vm13 }
 0x4a1   : > { %1511 = vmatprep.subr.bf16.mxu0 %v1755_v61  ;;  %vm1005_vm5 = vmor %vm941_vm2, %vm989_vm3 }
 0x4a2   : > { %vm1420_vm6 = vmpackc.low %vm1006_vm4, %vm1005_vm5 }
 0x4a8   : > { %1512 = vmatpush3.bf16.xpose.msk.msra.mxu0 %vm1418_vm14, %v1757_v8 }
 0x4a9   : > { %1513 = vmatprep.subr.bf16.mxu0 %v1755_v61 }
 0x4b0   : > { %1514 = vmatpush3.bf16.xpose.msk.msra.mxu0 %vm1420_vm6, %v1757_v8 }
 0x4b7   : > { %1516 = vmatmul.mubr.bf16.vlgmr.msra.gmra.mxu0 %v1979_v53 }
 0x577   : > { %v1096_v55 = vpop.f32.mrf.mxu0 }
 0x578   : > { %v1102_v56 = vadd.f32 %v1096_v55, %v1061_v54 }
 0x579   : > { %v1517_v57 = vpop.f32.mrf.mxu0 }
 0x57a   : > { %1103 = vst [vmem:[#allocation2] sm:$0x3] %v1102_v56 }
 0x57b   : > { %v1099_v58 = vpop.f32.mrf.mxu0 }
 0x57d   : > { %v1518_v59 = vpop.f32.mrf.mxu0 }
 0x57e PF: > { %p1422_p11 = scmp.ne.s32.totalorder %s1718_s15, 1 }
 0x580   : > { %1107 = sbr.rel (%p1422_p11) target bundleno = 1772 (0x6ec), region = 52 }
 0x585   : > { %v1110_v21 = vld [vmem:[#allocation3] sm:$0x1]  ;;  %v1758_v61 = vmov 0   ;;  %v1124_v29 = vlaneseq  ;;  %v1109_v30 = vld [vmem:[#allocation2 + $0x1] sm:$0x1] }
 0x586   : > { %1629 = vset.pattern.permute.xlu0 %v1758_v61  ;;  %v1118_v11 = vadd.f32 1.0, %v1109_v30  ;;  %v1108_v3 = vld [vmem:[#allocation2] sm:$0x1]  ;;  %v1112_v63 = vld [vmem:[%s1881_s18 + $0x1] sm:$0x1]  ;;  %vm1134_vm7 = vcmp.lt.f32.partialorder %v1109_v30, 0.5 }
 0x587   : > { %1121 = vperm.xlu0 %1629, %v1110_v21   ;;  %v1125_v9 = vshrl.u32 %v1124_v29, 7  ;;  %v1117_v60 = vadd.f32 %v1112_v63, %v1108_v3  ;;  %v1113_v48 = vmul.f32 2.0, %v1112_v63  ;;  %v1111_v16 = vld [vmem:[%s1881_s18] sm:$0x1] }
 0x589   : > { %v1126_v53 = vsub.s32 0, %v1125_v9  ;;  %v1423_v62 = vadd.f32 -1.0, %v1113_v48 }
 0x58b   : > { %v1115_v0 = vmul.f32 %v1423_v62, %v1111_v16 }
 0x58d   : > { %v1116_v2 = vsub.f32 1.0, %v1115_v0 }
 0x58f   : > { %v1144_v14 = vmax.f32 %v1116_v2, 0.0 }
 0x602   : > { %v1122_v7 = vpop.permute.xlu0 %1121 }
 0x603   : > { %v1127_v35 = vrot.slane %v1122_v7, %v1126_v53 }
 0x605   : > { %v1128_v19 = vadd.f32 %v1127_v35, %v1118_v11  ;;  %v1135_v36 = vadd.f32 %v1127_v35, %v1109_v30  ;;  %v1130_v1 = vsub.f32 %v1127_v35, %v1117_v60  ;;  %v1138_v5 = vsub.f32 %v1127_v35, %v1108_v3 }
 0x607   : > { %v1129_v41 = vsub.f32 %v1128_v19, %v1117_v60  ;;  %v1136_v42 = vsub.f32 %v1135_v36, %v1108_v3 }
 0x609   : > { %1630 = vrcp.f32 %v1129_v41  ;;  %v1137_v33 = vsel %vm1134_vm7, 1.0, %v1136_v42 }
 0x60a   : > { %1632 = vrcp.f32 %v1137_v33 }
 0x616   : > { %v1631_v4 = vpop.eup %1630 }
 0x617   : > { %v1633_v8 = vpop.eup %1632  ;;  %v1132_v10 = vmul.f32 %v1631_v4, %v1130_v1 }
 0x618   : > { %v1140_v12 = vmul.f32 %v1633_v8, %v1138_v5 }
 0x619   : > { %v1133_v6 = vsub.f32 1.0, %v1132_v10 }
 0x61a   : > { %v1141_v13 = vsub.f32 1.0, %v1140_v12 }
 0x61c   : > { %v1142_v17 = vsub.f32 %v1133_v6, %v1141_v13 }
 0x61e   : > { %v1143_v18 = vsel %vm1134_vm7, %v1133_v6, %v1142_v17 }
 0x61f   : > { %v1145_v15 = vmul.f32 %v1144_v14, %v1143_v18 }
 0x621   : > { %v1146_v20 = vsel %vm426_vm1, %v1145_v15, 0.0 }
 0x622   : > { %1147 = vadd.xlane.f32.xlu0 %v1146_v20 }
 0x6ab   : > { %v1148_v24 = vpop.xlane.xlu0 %1147 }
 0x6ac   : > { %v1149_v25 = vrot.slane %v1148_v24, 4 }
 0x6ae   : > { %v1150_v26 = vadd.f32 %v1149_v25, %v1148_v24 }
 0x6b0   : > { %v1151_v23 = vrot.slane %v1150_v26, 2 }
 0x6b2   : > { %v1152_v31 = vadd.f32 %v1151_v23, %v1150_v26 }
 0x6b4   : > { %v1153_v32 = vrot.slane %v1152_v31, 1 }
 0x6b6   : > { %v1154_v28 = vadd.f32 %v1153_v32, %v1152_v31 }
 0x6b8   : > { %1519 = vpush %v1154_v28 }
 0x6e9   : > { %s1520_s14 = spop %1519 }
 0x6ea   : > { %v1156_v22 = vstv %s1520_s14 }
 0x6eb   : > { %1158 = vst [vmem:[%s1890_s23] sm:$0x1] %v1156_v22 }
 0x6ec PF: > { %s1424_s15 = sshll.u32 %s1726_s17, 1  ;;  %s1174_s8 = sshll.u32 %s1890_s23, 4  ;;  %s1175_s8 = int_to_ptr.vmem [resolvable:$true] %s1174_s8 }
 0x6ed   : > { %s1170_s18 = sadd.s32 %s1722_s16, %s1424_s15  ;;  %s2321_s5 = sand.u32 1, %s1710_s13  }
 0x6ee   : > { %s1425_s10 = sshll.u32 %s1170_s18, 4  ;;  %s1160_s9 = scalar_lea.sflag [#allocation5], %s2321_s5 }
 0x6ef   : > { %s1172_s4 = scalar_lea.hbm %s2301_s3, %s1425_s10  ;;  %s1634_s11 = scalar_lea.vmem %s1175_s8, 16 }
 0x6f0   : > { %p1635_p12 = scmp.ne.s32.totalorder %s1175_s8, %s1634_s11  ;;  %s1759_s29 = smov [#allocation4]  }
 0x6f1   : > { %s1638_s19 = sshll.u32 %s1759_s29, 4  ;;  %s1639_s19 = int_to_ptr.vmem [resolvable:$false] %s1638_s19 }
 0x6f2   : > { %p1636_p13 = pnand %p1635_p12, %p1842_p6  ;;  %s1640_s20 = scalar_lea.vmem %s1639_s19, 32 }
 0x6f3   : > { %p1641_p1 = scmp.lt.s32.totalorder %s1175_s8, %s1639_s19  ;;  %p1642_p2 = scmp.lt.s32.totalorder %s1640_s20, %s1634_s11 }
 0x6f4   : > { %p1637_p0 = pneg %p1636_p13 }
 0x6f5   : > { %p1643_p3 = por %p1642_p2, %p1641_p1 }
 0x6f7   : > { %p1644_p4 = pnand %p1643_p3, %p1637_p0 }
 0x6f9   : > { %1647 = shalt.err (!%p1644_p4)
}
 0x6fa   : > { %s1648_s16 = scalar_lea.hbm %s1172_s4, 16  ;;  %s1652_s24 = scalar_lea.hbm %s2301_s3, 64 }
 0x6fb   : > { %p1649_p5 = scmp.ne.s32.totalorder %s1172_s4, %s1648_s16  ;;  %p1653_p10 = scmp.lt.s32.totalorder %s1172_s4, %s2301_s3 }
 0x6fc   : > { %p1654_p11 = scmp.lt.s32.totalorder %s1652_s24, %s1648_s16 }
 0x6fd   : > { %p1650_p8 = pnand %p1649_p5, %p1842_p6 }
 0x6fe   : > { %p1655_p12 = por %p1654_p11, %p1653_p10 }
 0x6ff   : > { %p1651_p9 = pneg %p1650_p8 }
 0x701   : > { %p1656_p13 = pnand %p1655_p12, %p1651_p9 }
 0x703   : > { %1659 = shalt.err (!%p1656_p13)
}
 0x704   : > { %1521 = dma.vmem_to_hbm [thread:$0]  (%p1842_p6), %s1175_s8, 16, %s1172_s4, %s1160_s9  }
 0x705 PF: > { %p1527_p0 = scmp.ge.s32.totalorder %s1742_s21, 2  ;;  %s1186_s6 = sand.u32 1, %s1706_s12  }
 0x706   : > { %s1187_s7 = scalar_lea.sflag [#allocation5], %s1186_s6 }
 0x707   : > { %p1524_p1 = pnand %p1527_p0, %p1849_p7 }
 0x709   : > { %p1525_p2 = pneg %p1524_p1 }
 0x70b   : > { %1701 = dma.done.wait (%p1525_p2), %s1187_s7, 16  }
 0x70c   : > { %1703 = vsyncadd (%p1525_p2), %s1187_s7, 4294967280  ;;  %s16_s21 = sadd.s32 1, %s1742_s21   ;;  %s2322_s14 = sld [smem:[#allocation7_spill]] }
 0x70d   : > { %p13_p3 = scmp.ge.s32.totalorder %s16_s21, 10   ;;  %s2323_s15 = sld [smem:[#allocation14_spill]] }
 0x70e   : > { %s2324_s27 = sld [smem:[#allocation8_spill]]  ;;  %s2330_s12 = smov %s1710_s13 }
 0x70f   : > { %s2325_s16 = sld [smem:[#allocation9_spill]] }
 0x710   : > { %s2326_s17 = sld [smem:[#allocation10_spill]]  ;;  %15 = sbr.rel (!%p13_p3) target bundleno = 6 (0x6), region = 93 }
 0x711   : > { %s2327_s18 = sld [smem:[#allocation11_spill]] }
 0x712   : > { %s2328_s19 = sld [smem:[#allocation12_spill]]  ;;  %s2331_s13 = smov %s2322_s14 }
 0x713   : > { %s2329_s20 = sld [smem:[#allocation13_spill]]  ;;  %s2332_s14 = smov %s2323_s15 }
 0x714   : > { %s2333_s15 = smov %s2324_s27 }
 0x715   :  { %1191 = vsyncpa [#allocation5], 1 }
 0x716   :  { %1193 = vsyncpa [#allocation5 + $0x1], 1 }

</bundles_post_ra>
